<compile_context>
chip_gen: v7x
topology: tpu7x:2x2x1
jax: 0.10.0
libtpu: 0.0.40
codegen_flags: <defaults>
</compile_context>

<pallas_src>
import functools

import numpy as np
import jax
import jax.numpy as jnp
from jax.experimental import pallas as pl
from jax.experimental.pallas import tpu as pltpu


def _g2a_kernel(obs_ref, w_enc_ref, b_enc_ref, w_head_ref, dgb_ref,
                out_ref, z_ref, *, tb, n):
    """One block of `tb` threads per grid step.

    obs_ref    : (tb * n, obs_dim)   rows = (thread, agent) flattened
    w_enc_ref  : (obs_dim, H)        b_enc_ref : (1, H)
    w_head_ref : (H, 2)              differenced hard-head weights, pre-scaled by 1/tau
                                     (col 0 acts on h_i, col 1 acts on h_j)
    dgb_ref    : (tb, n, n)          ((g1 - g0) + b_diff) / tau
    out_ref    : (tb, n, n)          gate(i, j) = gumbel_softmax(logits)[..., 1]
    z_ref      : (tb, n, n)          VMEM scratch for pre-sigmoid logits
    """
    # Batched encoder: one big matmul over all tb*n rows.
    h = jnp.dot(obs_ref[...], w_enc_ref[...], preferred_element_type=jnp.float32)
    h = jnp.maximum(h + b_enc_ref[...], 0.0)                      # (tb*n, H)

    # Fused hard-attention head (already differenced & tau-scaled):
    #   uv[:, 0] = h_row . (W_hard[:H, 1] - W_hard[:H, 0]) / tau   ("i" term)
    #   uv[:, 1] = h_row . (W_hard[H:, 1] - W_hard[H:, 0]) / tau   ("j" term)
    uv = jnp.dot(h, w_head_ref[...], preferred_element_type=jnp.float32)  # (tb*n, 2)
    v_row = jnp.transpose(uv[:, 1:2])                                     # (1, tb*n)

    # Per-thread outer sum  z[t, i, j] = u[t, i] + v[t, j] + dgb[t, i, j].
    # (unrolled over the static thread-batch; all heavy math stays vectorized)
    for t in range(tb):
        r0 = t * n
        u_t = uv[r0:r0 + n, 0:1]            # (n, 1)
        v_t = v_row[:, r0:r0 + n]           # (1, n)
        z_ref[t] = u_t + v_t + dgb_ref[t]   # (n, n)

    # Single vectorized, numerically stable sigmoid over the whole block
    # (softmax([z0, z1])[1] == sigmoid(z1 - z0); one exp per element).
    z = z_ref[...]
    ez = jnp.exp(-jnp.abs(z))
    denom = 1.0 + ez
    numer = jnp.where(z >= 0.0, 1.0, ez)
    out_ref[...] = numer / denom


def _choose_thread_block(n_thread, n_agent, target_rows=256):
    """Pick threads-per-block so the encoder matmul sees ~target_rows rows."""
    tb = max(1, target_rows // max(n_agent, 1))
    if n_thread <= tb:
        return n_thread            # single grid step; block == full array
    while (tb * n_agent) % 8 != 0:  # keep the (8, 128) sublane tiling constraint
        tb += 1
    return tb


def _g2a_gates(obs, w_enc, b_enc, w_head, dgb, tb):
    """Pallas call producing the dense (T_pad, n_agent, n_agent) gate matrix."""
    t_pad, n_agent, obs_dim = obs.shape
    hidden = w_enc.shape[1]
    obs2 = obs.reshape(t_pad * n_agent, obs_dim)

    return pl.pallas_call(
        functools.partial(_g2a_kernel, tb=tb, n=n_agent),
        out_shape=jax.ShapeDtypeStruct((t_pad, n_agent, n_agent), jnp.float32),
        grid=(t_pad // tb,),
        in_specs=[
            pl.BlockSpec((tb * n_agent, obs_dim), lambda t: (t, 0)),
            pl.BlockSpec((obs_dim, hidden), lambda t: (0, 0)),     # constant block
            pl.BlockSpec((1, hidden), lambda t: (0, 0)),           # constant block
            pl.BlockSpec((hidden, 2), lambda t: (0, 0)),           # constant block
            pl.BlockSpec((tb, n_agent, n_agent), lambda t: (t, 0, 0)),
        ],
        out_specs=pl.BlockSpec((tb, n_agent, n_agent), lambda t: (t, 0, 0)),
        scratch_shapes=[pltpu.VMEM((tb, n_agent, n_agent), jnp.float32)],
        compiler_params=pltpu.CompilerParams(dimension_semantics=("parallel",)),
    )(obs2, w_enc, b_enc, w_head, dgb)


@functools.partial(jax.jit, static_argnames=("target_rows",))
def g2a_embed_forward(obs, params, gumbel, tau, target_rows=256):
    """Full forward: returns hard_weights with shape (n_agent, T, 1, n_agent - 1)."""
    # TODO(synk): the PyTorch forward print()s raw hard_weights for inspection;
    # debug printing is intentionally omitted here.
    T, n_agent, _ = obs.shape
    H = params["w_enc"].shape[1]
    inv_tau = 1.0 / tau

    w_enc = params["w_enc"].astype(jnp.float32)
    b_enc = params["b_enc"].reshape(1, H).astype(jnp.float32)
    w_hard = params["w_hard"].astype(jnp.float32)       # (2H, 2)
    b_hard = params["b_hard"].astype(jnp.float32)       # (2,)

    # gumbel_softmax(...)[..., 1] for 2 logits == sigmoid of the logit diff, so
    # fold the weight / bias / noise differences (and 1/tau) once in the wrapper.
    w_diff = (w_hard[:, 1] - w_hard[:, 0]) * inv_tau     # (2H,)
    w_head = jnp.stack([w_diff[:H], w_diff[H:]], axis=1)  # (H, 2)
    b_diff = (b_hard[1] - b_hard[0]) * inv_tau
    dgb = (gumbel[..., 1] - gumbel[..., 0]) * inv_tau + b_diff   # (T, n, n)

    tb = _choose_thread_block(T, n_agent, target_rows)
    t_pad = ((T + tb - 1) // tb) * tb
    obs_f = obs.astype(jnp.float32)
    if t_pad != T:
        pad = ((0, t_pad - T), (0, 0), (0, 0))
        obs_f = jnp.pad(obs_f, pad)
        dgb = jnp.pad(dgb, pad)

    gates_full = _g2a_gates(obs_f, w_enc, b_enc, w_head, dgb, tb)[:T]  # (T, n, n)

    # Glue: drop the diagonal (j != i) and permute to (n_agent, T, 1, n_agent-1).
    i_idx = np.arange(n_agent)[:, None]
    j_idx = np.array([[j for j in range(n_agent) if j != i] for i in range(n_agent)],
                     dtype=np.int32)
    gates = gates_full[:, i_idx, j_idx]                       # (T, n, n-1)
    return jnp.transpose(gates, (1, 0, 2))[:, :, None, :]     # (n, T, 1, n-1)


def _reference(obs, params, gumbel, tau):
    """Pure-JAX re-implementation mirroring the PyTorch loop structure."""
    T, n_agent, _ = obs.shape
    hp = jax.lax.Precision.HIGHEST
    h = jax.nn.relu(jnp.dot(obs, params["w_enc"], precision=hp) + params["b_enc"])
    per_i = []
    for i in range(n_agent):
        cols = []
        for j in range(n_agent):
            if j == i:
                continue
            pair = jnp.concatenate([h[:, i], h[:, j]], axis=-1)              # (T, 2H)
            logits = jnp.dot(pair, params["w_hard"], precision=hp) + params["b_hard"]
            z = (logits + gumbel[:, i, j]) / tau
            cols.append(jax.nn.softmax(z, axis=-1)[:, 1])                    # (T,)
        per_i.append(jnp.stack(cols, axis=-1))                               # (T, n-1)
    return jnp.stack(per_i, axis=0)[:, :, None, :]                           # (n, T, 1, n-1)


if __name__ == "__main__":
    T, n_agent, obs_dim, hidden = 2, 4, 16, 32
    tau = 0.01

    key = jax.random.PRNGKey(0)
    k_obs, k_we, k_be, k_wh, k_bh, k_noise = jax.random.split(key, 6)

    obs = jax.random.normal(k_obs, (T, n_agent, obs_dim), dtype=jnp.float32)
    params = {
        "w_enc": 0.1 * jax.random.normal(k_we, (obs_dim, hidden), dtype=jnp.float32),
        "b_enc": 0.1 * jax.random.normal(k_be, (hidden,), dtype=jnp.float32),
        "w_hard": 0.1 * jax.random.normal(k_wh, (2 * hidden, 2), dtype=jnp.float32),
        "b_hard": 0.1 * jax.random.normal(k_bh, (2,), dtype=jnp.float32),
    }
    # Standard Gumbel noise for gumbel_softmax (deterministic given the key);
    # sampled once and shared between kernel and reference.
    gumbel = jax.random.gumbel(k_noise, (T, n_agent, n_agent, 2), dtype=jnp.float32)

    out = g2a_embed_forward(obs, params, gumbel, tau)
    out = jax.block_until_ready(out)

    assert out.shape == (n_agent, T, 1, n_agent - 1)
    ref = _reference(obs, params, gumbel, tau)
    np.testing.assert_allclose(np.asarray(out), np.asarray(ref), rtol=1e-5, atol=1e-5)

    print("KERNEL_OK")
</pallas_src>

<mosaic_0001>
module attributes {stable_mosaic.version = 11 : i64} {
  func.func @_g2a_kernel(%arg0: i32, %arg1: memref<8x16xf32, #tpu.memory_space<vmem>>, %arg2: memref<16x32xf32, #tpu.memory_space<vmem>>, %arg3: memref<1x32xf32, #tpu.memory_space<vmem>>, %arg4: memref<32x2xf32, #tpu.memory_space<vmem>>, %arg5: memref<2x4x4xf32, #tpu.memory_space<vmem>>, %arg6: memref<2x4x4xf32, #tpu.memory_space<vmem>>, %arg7: memref<2x4x4xf32, #tpu.memory_space<vmem>>) attributes {dimension_semantics = [#tpu.dimension_semantics<parallel>], iteration_bounds = array<i64: 1>, scalar_prefetch = 0 : i64, scratch_operands = 1 : i64, tpu.core_type = #tpu.core_type<tc>, window_params = [{transform_indices = @transform_0, window_bounds = array<i64: 8, 16>}, {pipeline_mode = #tpu.pipeline_mode<synchronous>, transform_indices = @transform_1, window_bounds = array<i64: 16, 32>}, {pipeline_mode = #tpu.pipeline_mode<synchronous>, transform_indices = @transform_2, window_bounds = array<i64: 1, 32>}, {pipeline_mode = #tpu.pipeline_mode<synchronous>, transform_indices = @transform_3, window_bounds = array<i64: 32, 2>}, {transform_indices = @transform_4, window_bounds = array<i64: 2, 4, 4>}, {transform_indices = @transform_5, window_bounds = array<i64: 2, 4, 4>}]} {
    %c0 = arith.constant 0 : index
    %c0_0 = arith.constant 0 : index
    %0 = vector.load %arg1[%c0, %c0_0] : memref<8x16xf32, #tpu.memory_space<vmem>>, vector<8x16xf32>
    %c0_1 = arith.constant 0 : index
    %c0_2 = arith.constant 0 : index
    %1 = vector.load %arg2[%c0_1, %c0_2] : memref<16x32xf32, #tpu.memory_space<vmem>>, vector<16x32xf32>
    %cst = arith.constant dense<0.000000e+00> : vector<8x32xf32>
    %2 = tpu.matmul %0, %1, %cst {dimension_numbers = #tpu.dot_dimension_numbers<[1], [0], [0], [1], [0, 0, 1, 1], [], []>} : vector<8x16xf32>, vector<16x32xf32>, vector<8x32xf32> -> vector<8x32xf32>
    %c0_3 = arith.constant 0 : index
    %c0_4 = arith.constant 0 : index
    %3 = vector.load %arg3[%c0_3, %c0_4] : memref<1x32xf32, #tpu.memory_space<vmem>>, vector<1x32xf32>
    %4 = vector.broadcast %3 : vector<1x32xf32> to vector<8x32xf32>
    %5 = arith.addf %2, %4 : vector<8x32xf32>
    %cst_5 = arith.constant 0.000000e+00 : f32
    %6 = vector.broadcast %cst_5 : f32 to vector<8x32xf32>
    %7 = arith.maximumf %5, %6 : vector<8x32xf32>
    %c0_6 = arith.constant 0 : index
    %c0_7 = arith.constant 0 : index
    %8 = vector.load %arg4[%c0_6, %c0_7] : memref<32x2xf32, #tpu.memory_space<vmem>>, vector<32x2xf32>
    %cst_8 = arith.constant dense<0.000000e+00> : vector<8x2xf32>
    %9 = tpu.matmul %7, %8, %cst_8 {dimension_numbers = #tpu.dot_dimension_numbers<[1], [0], [0], [1], [0, 0, 1, 1], [], []>} : vector<8x32xf32>, vector<32x2xf32>, vector<8x2xf32> -> vector<8x2xf32>
    %10 = vector.extract_strided_slice %9 {offsets = [0, 1], sizes = [8, 1], strides = [1, 1]} : vector<8x2xf32> to vector<8x1xf32>
    %11 = tpu.transpose %10, [1, 0] : vector<8x1xf32> -> vector<1x8xf32>
    %12 = vector.extract_strided_slice %9 {offsets = [0, 0], sizes = [4, 1], strides = [1, 1]} : vector<8x2xf32> to vector<4x1xf32>
    %13 = vector.extract_strided_slice %11 {offsets = [0, 0], sizes = [1, 4], strides = [1, 1]} : vector<1x8xf32> to vector<1x4xf32>
    %14 = vector.broadcast %12 : vector<4x1xf32> to vector<4x4xf32>
    %15 = vector.broadcast %13 : vector<1x4xf32> to vector<4x4xf32>
    %16 = arith.addf %14, %15 : vector<4x4xf32>
    %c0_9 = arith.constant 0 : index
    %c0_10 = arith.constant 0 : index
    %c0_11 = arith.constant 0 : index
    %17 = vector.load %arg5[%c0_9, %c0_10, %c0_11] : memref<2x4x4xf32, #tpu.memory_space<vmem>>, vector<1x4x4xf32>
    %18 = vector.shape_cast %17 : vector<1x4x4xf32> to vector<4x4xf32>
    %19 = arith.addf %16, %18 : vector<4x4xf32>
    %c0_12 = arith.constant 0 : index
    %c0_13 = arith.constant 0 : index
    %c0_14 = arith.constant 0 : index
    %20 = vector.load %arg7[%c0_12, %c0_13, %c0_14] : memref<2x4x4xf32, #tpu.memory_space<vmem>>, vector<1x4x4xf32>
    %21 = vector.shape_cast %20 : vector<1x4x4xf32> to vector<4x4xf32>
    %22 = vector.shape_cast %19 : vector<4x4xf32> to vector<1x4x4xf32>
    tpu.vector_store %arg7[%c0_12, %c0_13, %c0_14], %22 {strides = array<i32>} : memref<2x4x4xf32, #tpu.memory_space<vmem>>, vector<1x4x4xf32>,
    %23 = vector.extract_strided_slice %9 {offsets = [4, 0], sizes = [4, 1], strides = [1, 1]} : vector<8x2xf32> to vector<4x1xf32>
    %24 = vector.extract_strided_slice %11 {offsets = [0, 4], sizes = [1, 4], strides = [1, 1]} : vector<1x8xf32> to vector<1x4xf32>
    %25 = vector.broadcast %23 : vector<4x1xf32> to vector<4x4xf32>
    %26 = vector.broadcast %24 : vector<1x4xf32> to vector<4x4xf32>
    %27 = arith.addf %25, %26 : vector<4x4xf32>
    %c1 = arith.constant 1 : index
    %c0_15 = arith.constant 0 : index
    %c0_16 = arith.constant 0 : index
    %28 = vector.load %arg5[%c1, %c0_15, %c0_16] : memref<2x4x4xf32, #tpu.memory_space<vmem>>, vector<1x4x4xf32>
    %29 = vector.shape_cast %28 : vector<1x4x4xf32> to vector<4x4xf32>
    %30 = arith.addf %27, %29 : vector<4x4xf32>
    %c1_17 = arith.constant 1 : index
    %c0_18 = arith.constant 0 : index
    %c0_19 = arith.constant 0 : index
    %31 = vector.load %arg7[%c1_17, %c0_18, %c0_19] : memref<2x4x4xf32, #tpu.memory_space<vmem>>, vector<1x4x4xf32>
    %32 = vector.shape_cast %31 : vector<1x4x4xf32> to vector<4x4xf32>
    %33 = vector.shape_cast %30 : vector<4x4xf32> to vector<1x4x4xf32>
    tpu.vector_store %arg7[%c1_17, %c0_18, %c0_19], %33 {strides = array<i32>} : memref<2x4x4xf32, #tpu.memory_space<vmem>>, vector<1x4x4xf32>,
    %c0_20 = arith.constant 0 : index
    %c0_21 = arith.constant 0 : index
    %c0_22 = arith.constant 0 : index
    %34 = vector.load %arg7[%c0_20, %c0_21, %c0_22] : memref<2x4x4xf32, #tpu.memory_space<vmem>>, vector<2x4x4xf32>
    %35 = math.absf %34 : vector<2x4x4xf32>
    %cst_23 = arith.constant 0.000000e+00 : f32
    %36 = vector.broadcast %cst_23 : f32 to vector<2x4x4xf32>
    %37 = arith.subf %36, %35 : vector<2x4x4xf32>
    %38 = math.exp %37 : vector<2x4x4xf32>
    %cst_24 = arith.constant 1.000000e+00 : f32
    %39 = vector.broadcast %cst_24 : f32 to vector<2x4x4xf32>
    %40 = arith.addf %39, %38 : vector<2x4x4xf32>
    %cst_25 = arith.constant 0.000000e+00 : f32
    %41 = vector.broadcast %cst_25 : f32 to vector<2x4x4xf32>
    %42 = arith.cmpf oge, %34, %41 : vector<2x4x4xf32>
    %cst_26 = arith.constant 1.000000e+00 : f32
    %43 = vector.broadcast %cst_26 : f32 to vector<2x4x4xf32>
    %44 = arith.select %42, %43, %38 : vector<2x4x4xi1>, vector<2x4x4xf32>
    %45 = arith.divf %44, %40 : vector<2x4x4xf32>
    %c0_27 = arith.constant 0 : index
    %c0_28 = arith.constant 0 : index
    %c0_29 = arith.constant 0 : index
    %46 = vector.load %arg6[%c0_27, %c0_28, %c0_29] : memref<2x4x4xf32, #tpu.memory_space<vmem>>, vector<2x4x4xf32>
    tpu.vector_store %arg6[%c0_27, %c0_28, %c0_29], %45 {strides = array<i32>} : memref<2x4x4xf32, #tpu.memory_space<vmem>>, vector<2x4x4xf32>,
    return
  }
  func.func @transform_0(%arg0: i32) -> (i32, i32) {
    %c0_i32 = arith.constant 0 : i32
    %c0_i32_0 = arith.constant 0 : i32
    return %arg0, %c0_i32 : i32, i32
  }
  func.func @transform_1(%arg0: i32) -> (i32, i32) {
    %c0_i32 = arith.constant 0 : i32
    %c0_i32_0 = arith.constant 0 : i32
    %c0_i32_1 = arith.constant 0 : i32
    return %c0_i32, %c0_i32_0 : i32, i32
  }
  func.func @transform_2(%arg0: i32) -> (i32, i32) {
    %c0_i32 = arith.constant 0 : i32
    %c0_i32_0 = arith.constant 0 : i32
    %c0_i32_1 = arith.constant 0 : i32
    return %c0_i32, %c0_i32_0 : i32, i32
  }
  func.func @transform_3(%arg0: i32) -> (i32, i32) {
    %c0_i32 = arith.constant 0 : i32
    %c0_i32_0 = arith.constant 0 : i32
    %c0_i32_1 = arith.constant 0 : i32
    return %c0_i32, %c0_i32_0 : i32, i32
  }
  func.func @transform_4(%arg0: i32) -> (i32, i32, i32) {
    %c0_i32 = arith.constant 0 : i32
    %c0_i32_0 = arith.constant 0 : i32
    %c0_i32_1 = arith.constant 0 : i32
    return %arg0, %c0_i32, %c0_i32_0 : i32, i32, i32
  }
  func.func @transform_5(%arg0: i32) -> (i32, i32, i32) {
    %c0_i32 = arith.constant 0 : i32
    %c0_i32_0 = arith.constant 0 : i32
    %c0_i32_1 = arith.constant 0 : i32
    return %arg0, %c0_i32, %c0_i32_0 : i32, i32, i32
  }
}

</mosaic_0001>

<bundles_post_ra>
// kernel: g2a_embed_forward.1
= control target key start
LH: loop header
LB: loop body
LE: loop exit
PB: predicated region body
PF: predicated region fallthrough
CT: control target
= control target key end

     0   :  { %v328_v0 = vmov 0.0|0.0   ;;  %vm329_vm0 = vmmov 0   ;;  %v330_v3 = vmov 0.0   ;;  %vm30_vm1 = vcmask 130048   ;;  %s333_s9 = smov 127   ;;  %s334_s11 = smov 124   ;;  %s404_s1 = inlined_call_operand.vmem [shape: f32[16,32], index: 1, kind: input, shape index: {}]   ;;  %s405_s3 = inlined_call_operand.vmem [shape: f32[32,2], index: 3, kind: input, shape index: {}]   ;;  %s406_s0 = inlined_call_operand.vmem [shape: f32[8,16], index: 0, kind: input, shape index: {}]   ;;  %s407_s2 = inlined_call_operand.vmem [shape: f32[1,32], index: 2, kind: input, shape index: {}]   ;;  %s408_s4 = inlined_call_operand.vmem [shape: f32[2,4,4], index: 4, kind: input, shape index: {}]   ;;  %s409_s5 = inlined_call_operand.vmem [shape: f32[2,4,4], index: 5, kind: output, shape index: {}]  }
   0x1   :  { %303 = vmatprep.subr.bf16.mxu0 %v328_v0  ;;  %v21_v1 = vld [vmem:[%s404_s1] sm:$0xff]  ;;  %v22_v2 = vld [vmem:[%s404_s1 + $0x8] sm:$0xff]  ;;  %289 = vmatprep.mubr.msk.f32.mxu0 %vm329_vm0, %v330_v3  ;;  %v107_v9 = vld [vmem:[%s405_s3 + $0x10] sm:$0xff]  ;;  %vm109_vm2 = vcmask 261120   ;;  %v331_v17 = vmov 0   ;;  %v223_v23 = vlaneseq  ;;  %vm230_vm3 = vcmask 27648  }
   0x2   :  { %v304_v4 = vpack.c.bf16 %v22_v2, %v21_v1  ;;  %306 = vmatprep.subr.bf16.mxu1 %v328_v0  ;;  %v105_v5 = vld [vmem:[%s405_s3] sm:$0xff]  ;;  %v106_v6 = vld [vmem:[%s405_s3 + $0x8] sm:$0xff]  ;;  %300 = vmatprep.mubr.msk.f32.mxu1 %vm329_vm0, %v330_v3  ;;  %v108_v10 = vld [vmem:[%s405_s3 + $0x18] sm:$0xff]  ;;  %s332_s3 = smov 4   ;;  %vm245_vm5 = vcmask 31748  }
   0x3   :  { %v307_v7 = vpack.c.bf16 %v106_v6, %v105_v5  ;;  %v20_v8 = vld [vmem:[%s406_s0] sm:$0xff]  ;;  %v310_v11 = vpack.c.bf16 %v108_v10, %v107_v9  ;;  %319 = vset.pattern.permute.xlu0 %v331_v17  ;;  %v224_v24 = vshrl.u32 %v223_v23, 7 }
   0x4   :  { %305 = vmatpush3.bf16.msra.mxu0 %v304_v4  ;;  %v273_v12 = vld [vmem:[%s407_s2] ss:$0 sm:$0xff]  ;;  %v276_v18 = vld [vmem:[%s408_s4 + $0x4] sm:$0xf] }
   0x5   :  { %308 = vmatpush3.bf16.msra.mxu1 %v307_v7  ;;  %v235_v19 = vrot.slane %v276_v18, 4  ;;  %v225_v26 = vsub.s32 0, %v224_v24  ;;  %v228_v29 = vld [vmem:[%s408_s4] sm:$0xf] }
   0x6   :  { %309 = vmatprep.subr.bf16.mxu1 %v328_v0 }
   0x7   :  { %290 = vmatmul.mubr.msk.f32.vlgmr.msra.gmra.mrb[0].mxu0 %vm30_vm1, %v20_v8  ;;  %236 = vrot.lane.b32.xlu1 %v235_v19, %s332_s3 }
   0x9   :  { %311 = vmatpush3.bf16.msra.mxu1 %v310_v11 }
  0x79   :  { %v237_v25 = vpop.permute.xlu1 %236 }
  0xda   :  { %v100_v13 = vpop.f32.mrb[0].mxu0 }
  0xdb   :  { %v101_v14 = vadd.f32 %v273_v12, %v100_v13  ;;  %v291_v15 = vpop.f32.mrb[1].mxu0 }
  0xdd   :  { %v104_v16 = vmax.f32 %v101_v14, 0.0 }
  0xdf   :  { %301 = vmatmul.mubr.msk.f32.vlgmr.msra.gmra.mrb[0].mxu1 %vm109_vm2, %v104_v16 }
 0x1b2   :  { %v179_v20 = vpop.f32.mrb[0].mxu1 }
 0x1b3   :  { %184 = vrot.lane.b32.xlu0 %v179_v20, %s333_s9  ;;  %v302_v21 = vpop.f32.mrb[1].mxu1 }
 0x1b7   :  { %220 = vperm.xlu0 %319, %v179_v20  }
 0x225   :  { %v185_v22 = vpop.permute.xlu0 %184 }
 0x226   :  { %187 = vxpose.xlu1.b32.start.end [1/1] (short) (narrow) %v185_v22, 8 }
 0x236   :  { %v221_v30 = vpop.permute.xlu0 %220 }
 0x2a6   :  { %v203_v27 = vpop.trf.xlu1 }
 0x2a7   :  { %v226_v28 = vrot.slane %v203_v27, %v225_v26 }
 0x2a9   :  { %v227_v31 = vadd.f32 %v226_v28, %v221_v30 }
 0x2ab   :  { %v229_v32 = vadd.f32 %v228_v29, %v227_v31  ;;  %v239_v33 = vadd.f32 %v237_v25, %v227_v31 }
 0x2ad   :  { %231 = vst.msk [vmem:[#allocation2] sm:$0xf] %vm230_vm3, %v229_v32  ;;  %241 = vrot.lane.b32.xlu0 %v239_v33, %s334_s11 }
 0x2b4   :  { %v247_v34 = vld [vmem:[#allocation2] sm:$0xf] }
 0x2b5   :  { %v249_v35 = vand.u32 2147483647, %v247_v34  ;;  %vm259_vm4 = vcmp.ge.f32.partialorder %v247_v34, 0.0 }
 0x2b7   :  { %v251_v36 = vsub.f32 0.0, %v249_v35 }
 0x2b9   :  { %v253_v37 = vmul.f32 1.442695, %v251_v36 }
 0x2bb   :  { %320 = vpow2.f32 %v253_v37 }
 0x2c5   :  { %v321_v38 = vpop.eup %320 }
 0x2c6   :  { %v257_v39 = vadd.f32 1.0, %v321_v38  ;;  %v261_v41 = vsel %vm259_vm4, 1.0, %v321_v38 }
 0x2c8   :  { %322 = vrcp.f32 %v257_v39 }
 0x2d2   :  { %v323_v40 = vpop.eup %322 }
 0x2d3   :  { %v264_v42 = vmul.f32 %v323_v40, %v261_v41 }
 0x2d5   :  { %267 = vst.msk [vmem:[%s409_s5] sm:$0xf] %vm230_vm3, %v264_v42 }
 0x31f   :  { %v242_v43 = vpop.permute.xlu0 %241 }
 0x320   :  { %246 = vst.msk [vmem:[#allocation2] sm:$0xf0] %vm245_vm5, %v242_v43 }
 0x327   :  { %v248_v44 = vld [vmem:[#allocation2 + $0x4] sm:$0xf] }
 0x328   :  { %v250_v45 = vand.u32 2147483647, %v248_v44  ;;  %vm260_vm6 = vcmp.ge.f32.partialorder %v248_v44, 0.0 }
 0x32a   :  { %v252_v46 = vsub.f32 0.0, %v250_v45 }
 0x32c   :  { %v255_v47 = vmul.f32 1.442695, %v252_v46 }
 0x32e   :  { %324 = vpow2.f32 %v255_v47 }
 0x338   :  { %v325_v48 = vpop.eup %324 }
 0x339   :  { %v258_v49 = vadd.f32 1.0, %v325_v48  ;;  %v262_v51 = vsel %vm260_vm6, 1.0, %v325_v48 }
 0x33b   :  { %326 = vrcp.f32 %v258_v49 }
 0x345   :  { %v327_v50 = vpop.eup %326 }
 0x346   :  { %v266_v52 = vmul.f32 %v327_v50, %v262_v51 }
 0x348   :  { %268 = vst.msk [vmem:[%s409_s5 + $0x4] sm:$0xf] %vm230_vm3, %v266_v52 }

</bundles_post_ra>
